<compile_context>
chip_gen: v5e
topology: v5e:2x2
jax: 0.10.0
libtpu: 0.0.40
codegen_flags: <defaults>
</compile_context>

<pallas_src>
import functools

import jax
import jax.numpy as jnp
from jax import lax
from jax.experimental import pallas as pl
from jax.experimental.pallas import tpu as pltpu


def _pad_to_multiple(x, axis, multiple):
    size = x.shape[axis]
    target = ((size + multiple - 1) // multiple) * multiple
    if target == size:
        return x
    widths = [(0, 0)] * x.ndim
    widths[axis] = (0, target - size)
    return jnp.pad(x, widths)


# ---------------------------------------------------------------------------
# Fused kernel: synthetic p_model candidate scoring + NCE likelihood + time MSE.
# One grid step handles BB sublane-aligned batch rows; the scalar loss is
# accumulated into a resident SMEM (1, 1) output.
# ---------------------------------------------------------------------------
def _nce_time_kernel(K, B_actual, seq_ref, lens_ref, tis_ref, time_ref,
                     ttime_ref, cand_ref, noise_ref, wt_ref, o_ref):
    BB, L, _ = seq_ref.shape
    K1 = noise_ref.shape[1]

    @pl.when(pl.program_id(0) == 0)
    def _():
        o_ref[0, 0] = jnp.float32(0.0)

    lens = lens_ref[...]                                             # (BB, 1)
    pos = lax.broadcasted_iota(jnp.int32, (BB, L), 1).astype(jnp.float32)
    seq_mask = (pos < lens).astype(jnp.float32)                      # (BB, L)

    # rows beyond the true batch (sublane padding) must not contribute
    row = (pl.program_id(0) * BB
           + lax.broadcasted_iota(jnp.int32, (BB, 1), 0))
    row_valid = (row < B_actual).astype(jnp.float32)                 # (BB, 1)

    # --- synthetic p_model user representation (masked mean-pool on MXU) ---
    inv_len = pl.reciprocal(jnp.maximum(lens, 1.0), approx=True)     # (BB, 1)
    pooled = jnp.einsum("bul,blh->buh", seq_mask[:, None, :], seq_ref[...],
                        preferred_element_type=jnp.float32)[:, 0, :]  # (BB, H)
    iv_feat = jnp.sum(tis_ref[...] * seq_mask, axis=1, keepdims=True) * inv_len
    user_p = pooled * inv_len + 0.001 * iv_feat                      # (BB, H)

    # --- candidate logits + interval head (contract on H, no transposes) ---
    actual_logits = jnp.einsum("buh,bkh->buk", user_p[:, None, :],
                               cand_ref[...],
                               preferred_element_type=jnp.float32)[:, 0, :]
    predict_intervals = jnp.einsum("bh,oh->bo", user_p, wt_ref[...],
                                   preferred_element_type=jnp.float32)

    # --- softmaxes: exp on the EUP, approx reciprocal instead of divides ---
    def _softmax(x):
        m = jnp.max(x, axis=-1, keepdims=True)
        e = jnp.exp(x - m)
        return e * pl.reciprocal(jnp.sum(e, axis=-1, keepdims=True),
                                 approx=True)

    noise_prob = _softmax(noise_ref[...])                            # (BB, K1)
    actual_prob = _softmax(actual_logits)                            # (BB, K1)

    # --- NCE likelihood -----------------------------------------------------
    deno = K * noise_prob + actual_prob + 1e-6
    inv_deno = pl.reciprocal(deno, approx=True)
    tmp1 = actual_prob * inv_deno
    tmp2 = noise_prob * inv_deno
    col = lax.broadcasted_iota(jnp.int32, (BB, K1), 1)
    likeli = jnp.where(col == 0, tmp1, tmp2)       # cat(tmp1[:,0:1], tmp2[:,1:])
    type_sum = -jnp.sum(jnp.log(likeli) * row_valid)

    # --- time loss ------------------------------------------------------------
    last_mask = (pos == (lens - 1.0)).astype(jnp.float32)            # (BB, L)
    last_time = jnp.sum(time_ref[...] * last_mask, axis=1, keepdims=True)
    target_interval = ttime_ref[...] - last_time                     # (BB, 1)
    gran = 24.0 * 30.0 * 6.0
    diff = (predict_intervals - target_interval) * (1.0 / gran)
    time_sum = jnp.sum(diff * diff * row_valid)

    o_ref[0, 0] += (type_sum * (1.0 / (B_actual * K1))        # -mean(log likeli)
                    + time_sum * (1.0 / (B_actual * 5.0)))    # MSE(...)/5


def _nce_time_loss_pallas(K, seq_emb_p, item_seq_len, time_interval_seq,
                          time_seq, target_time, cand_emb, noise_u, w_time):
    B, L, _ = seq_emb_p.shape
    K1 = cand_emb.shape[1]

    # lane-dense hidden dim (x128) and sublane-dense batch (x8); zero padding
    # is exact for every contraction in the kernel (padded rows are masked).
    seq_p = _pad_to_multiple(_pad_to_multiple(seq_emb_p, 2, 128), 0, 8)
    cand_p = _pad_to_multiple(_pad_to_multiple(cand_emb, 2, 128), 0, 8)
    wt_p = _pad_to_multiple(w_time, 1, 128)
    lens_p = _pad_to_multiple(item_seq_len[:, None].astype(jnp.float32), 0, 8)
    tis_p = _pad_to_multiple(time_interval_seq.astype(jnp.float32), 0, 8)
    time_p = _pad_to_multiple(time_seq.astype(jnp.float32), 0, 8)
    tt_p = _pad_to_multiple(target_time[:, None].astype(jnp.float32), 0, 8)
    noise_p = _pad_to_multiple(noise_u.astype(jnp.float32), 0, 8)

    Bp, _, Hp = seq_p.shape
    BB = 8                                   # per-step batch tile (sublane height)
    grid = (Bp // BB,)

    kernel = functools.partial(_nce_time_kernel, float(K), int(B))
    loss = pl.pallas_call(
        kernel,
        out_shape=jax.ShapeDtypeStruct((1, 1), jnp.float32),
        grid=grid,
        in_specs=[
            pl.BlockSpec((BB, L, Hp), lambda i: (i, 0, 0)),    # seq_emb_p
            pl.BlockSpec((BB, 1), lambda i: (i, 0)),           # lens
            pl.BlockSpec((BB, L), lambda i: (i, 0)),           # time_interval_seq
            pl.BlockSpec((BB, L), lambda i: (i, 0)),           # time_seq
            pl.BlockSpec((BB, 1), lambda i: (i, 0)),           # target_time
            pl.BlockSpec((BB, K1, Hp), lambda i: (i, 0, 0)),   # cand_emb
            pl.BlockSpec((BB, K1), lambda i: (i, 0)),          # noise scores
            pl.BlockSpec((1, Hp), lambda i: (0, 0)),           # w_time
        ],
        out_specs=pl.BlockSpec(memory_space=pltpu.SMEM),  # resident scalar acc
        compiler_params=pltpu.CompilerParams(
            dimension_semantics=("arbitrary",)),
    )(seq_p, lens_p, tis_p, time_p, tt_p, cand_p, noise_p, wt_p)
    return loss[0, 0]


# ---------------------------------------------------------------------------
# Forward pass (sampling glue in plain JAX; everything else in the kernel).
# ---------------------------------------------------------------------------
def random_nce_time_forward(params, K, item_seq, item_seq_len, target_id,
                            time_seq, time_interval_seq, target_time,
                            sample_key):
    emb_p, w_time = params["emb_p"], params["w_time"]
    B, _ = item_seq.shape
    N, _ = emb_p.shape
    K1 = K + 1

    key_neg, key_noise = jax.random.split(sample_key)

    # ones.scatter_(1, target, 0); softmax; * one_hot -> uniform non-target dist
    one_hot = jnp.ones((B, N), jnp.float32).at[jnp.arange(B), target_id].set(0.0)
    one_hot_noise_prob = jax.nn.softmax(one_hot, axis=-1) * one_hot

    # TODO(synk): torch.multinomial(..., replacement=False) has no clean Pallas
    # equivalent; Gumbel top-K in plain JAX is distribution-equivalent.
    u = jax.random.uniform(key_neg, (B, N), minval=1e-10, maxval=1.0)
    gumbel = -jnp.log(-jnp.log(u))
    perturbed = jnp.where(one_hot_noise_prob > 0.0,
                          jnp.log(one_hot_noise_prob) + gumbel, -jnp.inf)
    _, neg_items = jax.lax.top_k(perturbed, K)                     # (B, K)
    pos_neg_items = jnp.concatenate([target_id[:, None], neg_items], axis=1)

    # noise scores: torch.rand(batch_size, K+1) (softmaxed inside the kernel)
    noise_u = jax.random.uniform(key_noise, (B, K1), dtype=jnp.float32)

    # synthetic p_model inputs (data-dependent gathers stay in XLA)
    seq_emb_p = emb_p[item_seq]                                    # (B, L, H)
    cand_emb = emb_p[pos_neg_items]                                # (B, K+1, H)

    return _nce_time_loss_pallas(K, seq_emb_p, item_seq_len, time_interval_seq,
                                 time_seq, target_time, cand_emb, noise_u,
                                 w_time)


if __name__ == "__main__":
    B, L, N, H, K = 2, 8, 128, 32, 7

    key = jax.random.PRNGKey(0)
    k_ep, k_wt, k_items, k_len, k_tgt, k_time, k_samp = jax.random.split(key, 7)

    params = {
        "emb_p": 0.1 * jax.random.normal(k_ep, (N, H), jnp.float32),
        "w_time": 0.1 * jax.random.normal(k_wt, (1, H), jnp.float32),
    }

    item_seq = jax.random.randint(k_items, (B, L), 1, N)
    item_seq_len = jax.random.randint(k_len, (B,), 2, L + 1)
    target_id = jax.random.randint(k_tgt, (B,), 1, N)
    time_seq = jnp.cumsum(
        jax.random.uniform(k_time, (B, L), minval=1.0, maxval=24.0), axis=1)
    time_interval_seq = jnp.diff(time_seq, axis=1,
                                 prepend=jnp.zeros((B, 1), jnp.float32))
    target_time = time_seq[:, -1] + 12.0

    loss = random_nce_time_forward(params, K, item_seq, item_seq_len,
                                   target_id, time_seq, time_interval_seq,
                                   target_time, k_samp)
    jax.block_until_ready(loss)
    assert jnp.isfinite(loss)
    print("KERNEL_OK")
</pallas_src>

<mosaic_0001>
module attributes {stable_mosaic.version = 11 : i64} {
  func.func @_nce_time_kernel(%arg0: i32, %arg1: memref<8x8x128xf32, #tpu.memory_space<vmem>>, %arg2: memref<8x1xf32, #tpu.memory_space<vmem>>, %arg3: memref<8x8xf32, #tpu.memory_space<vmem>>, %arg4: memref<8x8xf32, #tpu.memory_space<vmem>>, %arg5: memref<8x1xf32, #tpu.memory_space<vmem>>, %arg6: memref<8x8x128xf32, #tpu.memory_space<vmem>>, %arg7: memref<8x8xf32, #tpu.memory_space<vmem>>, %arg8: memref<1x128xf32, #tpu.memory_space<vmem>>, %arg9: memref<1x1xf32, #tpu.memory_space<smem>>) attributes {dimension_semantics = [#tpu.dimension_semantics<arbitrary>], iteration_bounds = array<i64: 1>, scalar_prefetch = 0 : i64, scratch_operands = 0 : i64, tpu.core_type = #tpu.core_type<tc>, window_params = [{transform_indices = @transform_0, window_bounds = array<i64: 8, 8, 128>}, {transform_indices = @transform_1, window_bounds = array<i64: 8, 1>}, {transform_indices = @transform_2, window_bounds = array<i64: 8, 8>}, {transform_indices = @transform_3, window_bounds = array<i64: 8, 8>}, {transform_indices = @transform_4, window_bounds = array<i64: 8, 1>}, {transform_indices = @transform_5, window_bounds = array<i64: 8, 8, 128>}, {transform_indices = @transform_6, window_bounds = array<i64: 8, 8>}, {pipeline_mode = #tpu.pipeline_mode<synchronous>, transform_indices = @transform_7, window_bounds = array<i64: 1, 128>}, {transform_indices = @transform_8, window_bounds = array<i64: 1, 1>}]} {
    %c0_i32 = arith.constant 0 : i32
    %0 = arith.cmpi eq, %arg0, %c0_i32 : i32
    %1 = arith.extui %0 : i1 to i32
    %c0_i32_0 = arith.constant 0 : i32
    %2 = arith.cmpi ne, %1, %c0_i32_0 : i32
    scf.if %2 {
      %cst_42 = arith.constant 0.000000e+00 : f32
      %c0_43 = arith.constant 0 : index
      %c0_44 = arith.constant 0 : index
      %110 = memref.load %arg9[%c0_43, %c0_44] : memref<1x1xf32, #tpu.memory_space<smem>>
      memref.store %cst_42, %arg9[%c0_43, %c0_44] : memref<1x1xf32, #tpu.memory_space<smem>>
    } else {
    }
    %c0 = arith.constant 0 : index
    %c0_1 = arith.constant 0 : index
    %3 = vector.load %arg2[%c0, %c0_1] : memref<8x1xf32, #tpu.memory_space<vmem>>, vector<8x1xf32>
    %4 = tpu.iota {dimensions = array<i32: 1>} : vector<8x8xi32>
    %5 = arith.sitofp %4 : vector<8x8xi32> to vector<8x8xf32>
    %6 = vector.broadcast %3 : vector<8x1xf32> to vector<8x8xf32>
    %7 = arith.cmpf olt, %5, %6 : vector<8x8xf32>
    %8 = arith.extui %7 : vector<8x8xi1> to vector<8x8xi32>
    %9 = arith.sitofp %8 : vector<8x8xi32> to vector<8x8xf32>
    %c8_i32 = arith.constant 8 : i32
    %10 = arith.muli %arg0, %c8_i32 : i32
    %11 = tpu.iota {dimensions = array<i32: 0>} : vector<8x1xi32>
    %12 = vector.broadcast %10 : i32 to vector<8x1xi32>
    %13 = arith.addi %12, %11 : vector<8x1xi32>
    %c2_i32 = arith.constant 2 : i32
    %14 = vector.broadcast %c2_i32 : i32 to vector<8x1xi32>
    %15 = arith.cmpi slt, %13, %14 : vector<8x1xi32>
    %16 = arith.extui %15 : vector<8x1xi1> to vector<8x1xi32>
    %17 = arith.sitofp %16 : vector<8x1xi32> to vector<8x1xf32>
    %cst = arith.constant 1.000000e+00 : f32
    %18 = vector.broadcast %cst : f32 to vector<8x1xf32>
    %19 = arith.maximumf %3, %18 : vector<8x1xf32>
    %20 = tpu.reciprocal %19 {approx = true} : vector<8x1xf32> -> vector<8x1xf32>
    %21 = vector.shape_cast %9 : vector<8x8xf32> to vector<8x1x8xf32>
    %c0_2 = arith.constant 0 : index
    %c0_3 = arith.constant 0 : index
    %c0_4 = arith.constant 0 : index
    %22 = vector.load %arg1[%c0_2, %c0_3, %c0_4] : memref<8x8x128xf32, #tpu.memory_space<vmem>>, vector<8x8x128xf32>
    "tpu.trace_start"() <{level = 10 : i32, message = "bul,blh->buh"}> : () -> ()
    %cst_5 = arith.constant dense<0.000000e+00> : vector<8x1x128xf32>
    %23 = tpu.matmul %21, %22, %cst_5 {dimension_numbers = #tpu.dot_dimension_numbers<[2], [1], [1], [2], [0, 0, 0, 1, 1, 2], [0], [0]>} : vector<8x1x8xf32>, vector<8x8x128xf32>, vector<8x1x128xf32> -> vector<8x1x128xf32>
    "tpu.trace_stop"() : () -> ()
    %24 = vector.shape_cast %23 : vector<8x1x128xf32> to vector<8x128xf32>
    %c0_6 = arith.constant 0 : index
    %c0_7 = arith.constant 0 : index
    %25 = vector.load %arg3[%c0_6, %c0_7] : memref<8x8xf32, #tpu.memory_space<vmem>>, vector<8x8xf32>
    %26 = arith.mulf %25, %9 : vector<8x8xf32>
    %cst_8 = arith.constant dense<0.000000e+00> : vector<8xf32>
    %27 = vector.multi_reduction <add>, %26, %cst_8 [1] : vector<8x8xf32> to vector<8xf32>
    %28 = vector.shape_cast %27 : vector<8xf32> to vector<8x1xf32>
    %29 = arith.mulf %28, %20 : vector<8x1xf32>
    %30 = vector.broadcast %20 : vector<8x1xf32> to vector<8x128xf32>
    %31 = arith.mulf %24, %30 : vector<8x128xf32>
    %cst_9 = arith.constant 1.000000e-03 : f32
    %32 = vector.broadcast %cst_9 : f32 to vector<8x1xf32>
    %33 = arith.mulf %32, %29 : vector<8x1xf32>
    %34 = vector.broadcast %33 : vector<8x1xf32> to vector<8x128xf32>
    %35 = arith.addf %31, %34 : vector<8x128xf32>
    %36 = vector.shape_cast %35 : vector<8x128xf32> to vector<8x1x128xf32>
    %c0_10 = arith.constant 0 : index
    %c0_11 = arith.constant 0 : index
    %c0_12 = arith.constant 0 : index
    %37 = vector.load %arg6[%c0_10, %c0_11, %c0_12] : memref<8x8x128xf32, #tpu.memory_space<vmem>>, vector<8x8x128xf32>
    "tpu.trace_start"() <{level = 10 : i32, message = "buh,bkh->buk"}> : () -> ()
    %cst_13 = arith.constant dense<0.000000e+00> : vector<8x1x8xf32>
    %38 = tpu.matmul %36, %37, %cst_13 {dimension_numbers = #tpu.dot_dimension_numbers<[2], [2], [1], [1], [0, 0, 0, 1, 1, 1], [0], [0]>} : vector<8x1x128xf32>, vector<8x8x128xf32>, vector<8x1x8xf32> -> vector<8x1x8xf32>
    "tpu.trace_stop"() : () -> ()
    %39 = vector.shape_cast %38 : vector<8x1x8xf32> to vector<8x8xf32>
    %c0_14 = arith.constant 0 : index
    %c0_15 = arith.constant 0 : index
    %40 = vector.load %arg8[%c0_14, %c0_15] : memref<1x128xf32, #tpu.memory_space<vmem>>, vector<1x128xf32>
    "tpu.trace_start"() <{level = 10 : i32, message = "bh,oh->bo"}> : () -> ()
    %cst_16 = arith.constant dense<0.000000e+00> : vector<8x1xf32>
    %41 = tpu.matmul %35, %40, %cst_16 {dimension_numbers = #tpu.dot_dimension_numbers<[1], [1], [0], [0], [0, 0, 1, 0], [], []>} : vector<8x128xf32>, vector<1x128xf32>, vector<8x1xf32> -> vector<8x1xf32>
    "tpu.trace_stop"() : () -> ()
    %c0_17 = arith.constant 0 : index
    %c0_18 = arith.constant 0 : index
    %42 = vector.load %arg7[%c0_17, %c0_18] : memref<8x8xf32, #tpu.memory_space<vmem>>, vector<8x8xf32>
    %cst_19 = arith.constant dense<0xFF800000> : vector<8xf32>
    %43 = vector.multi_reduction <maximumf>, %42, %cst_19 [1] : vector<8x8xf32> to vector<8xf32>
    %44 = vector.shape_cast %43 : vector<8xf32> to vector<8x1xf32>
    %45 = vector.broadcast %44 : vector<8x1xf32> to vector<8x8xf32>
    %46 = arith.subf %42, %45 : vector<8x8xf32>
    %47 = math.exp %46 : vector<8x8xf32>
    %cst_20 = arith.constant dense<0.000000e+00> : vector<8xf32>
    %48 = vector.multi_reduction <add>, %47, %cst_20 [1] : vector<8x8xf32> to vector<8xf32>
    %49 = vector.shape_cast %48 : vector<8xf32> to vector<8x1xf32>
    %50 = tpu.reciprocal %49 {approx = true} : vector<8x1xf32> -> vector<8x1xf32>
    %51 = vector.broadcast %50 : vector<8x1xf32> to vector<8x8xf32>
    %52 = arith.mulf %47, %51 : vector<8x8xf32>
    %cst_21 = arith.constant dense<0xFF800000> : vector<8xf32>
    %53 = vector.multi_reduction <maximumf>, %39, %cst_21 [1] : vector<8x8xf32> to vector<8xf32>
    %54 = vector.shape_cast %53 : vector<8xf32> to vector<8x1xf32>
    %55 = vector.broadcast %54 : vector<8x1xf32> to vector<8x8xf32>
    %56 = arith.subf %39, %55 : vector<8x8xf32>
    %57 = math.exp %56 : vector<8x8xf32>
    %cst_22 = arith.constant dense<0.000000e+00> : vector<8xf32>
    %58 = vector.multi_reduction <add>, %57, %cst_22 [1] : vector<8x8xf32> to vector<8xf32>
    %59 = vector.shape_cast %58 : vector<8xf32> to vector<8x1xf32>
    %60 = tpu.reciprocal %59 {approx = true} : vector<8x1xf32> -> vector<8x1xf32>
    %61 = vector.broadcast %60 : vector<8x1xf32> to vector<8x8xf32>
    %62 = arith.mulf %57, %61 : vector<8x8xf32>
    %cst_23 = arith.constant 7.000000e+00 : f32
    %63 = vector.broadcast %cst_23 : f32 to vector<8x8xf32>
    %64 = arith.mulf %63, %52 : vector<8x8xf32>
    %65 = arith.addf %64, %62 : vector<8x8xf32>
    %cst_24 = arith.constant 9.99999997E-7 : f32
    %66 = vector.broadcast %cst_24 : f32 to vector<8x8xf32>
    %67 = arith.addf %65, %66 : vector<8x8xf32>
    %68 = tpu.reciprocal %67 {approx = true} : vector<8x8xf32> -> vector<8x8xf32>
    %69 = arith.mulf %62, %68 : vector<8x8xf32>
    %70 = arith.mulf %52, %68 : vector<8x8xf32>
    %71 = tpu.iota {dimensions = array<i32: 1>} : vector<8x8xi32>
    %c0_i32_25 = arith.constant 0 : i32
    %72 = vector.broadcast %c0_i32_25 : i32 to vector<8x8xi32>
    %73 = arith.cmpi eq, %71, %72 : vector<8x8xi32>
    %74 = arith.select %73, %69, %70 : vector<8x8xi1>, vector<8x8xf32>
    %75 = math.log %74 : vector<8x8xf32>
    %76 = vector.broadcast %17 : vector<8x1xf32> to vector<8x8xf32>
    %77 = arith.mulf %75, %76 : vector<8x8xf32>
    %78 = vector.shape_cast %77 : vector<8x8xf32> to vector<1x8x8xf32>
    %cst_26 = arith.constant dense<0.000000e+00> : vector<1xf32>
    %79 = vector.multi_reduction <add>, %78, %cst_26 [1, 2] : vector<1x8x8xf32> to vector<1xf32>
    %80 = vector.shape_cast %79 : vector<1xf32> to vector<1x1x1xf32>
    %81 = vector.extract %80[0, 0, 0] : f32 from vector<1x1x1xf32>
    %cst_27 = arith.constant 0.000000e+00 : f32
    %82 = arith.subf %cst_27, %81 : f32
    %cst_28 = arith.constant 1.000000e+00 : f32
    %83 = vector.broadcast %cst_28 : f32 to vector<8x1xf32>
    %84 = arith.subf %3, %83 : vector<8x1xf32>
    %85 = vector.broadcast %84 : vector<8x1xf32> to vector<8x8xf32>
    %86 = arith.cmpf oeq, %5, %85 : vector<8x8xf32>
    %87 = arith.extui %86 : vector<8x8xi1> to vector<8x8xi32>
    %88 = arith.sitofp %87 : vector<8x8xi32> to vector<8x8xf32>
    %c0_29 = arith.constant 0 : index
    %c0_30 = arith.constant 0 : index
    %89 = vector.load %arg4[%c0_29, %c0_30] : memref<8x8xf32, #tpu.memory_space<vmem>>, vector<8x8xf32>
    %90 = arith.mulf %89, %88 : vector<8x8xf32>
    %cst_31 = arith.constant dense<0.000000e+00> : vector<8xf32>
    %91 = vector.multi_reduction <add>, %90, %cst_31 [1] : vector<8x8xf32> to vector<8xf32>
    %92 = vector.shape_cast %91 : vector<8xf32> to vector<8x1xf32>
    %c0_32 = arith.constant 0 : index
    %c0_33 = arith.constant 0 : index
    %93 = vector.load %arg5[%c0_32, %c0_33] : memref<8x1xf32, #tpu.memory_space<vmem>>, vector<8x1xf32>
    %94 = arith.subf %93, %92 : vector<8x1xf32>
    %95 = arith.subf %41, %94 : vector<8x1xf32>
    %cst_34 = arith.constant 2.31481477E-4 : f32
    %96 = vector.broadcast %cst_34 : f32 to vector<8x1xf32>
    %97 = arith.mulf %95, %96 : vector<8x1xf32>
    %98 = arith.mulf %97, %97 : vector<8x1xf32>
    %99 = arith.mulf %98, %17 : vector<8x1xf32>
    %100 = vector.shape_cast %99 : vector<8x1xf32> to vector<1x8x1xf32>
    %cst_35 = arith.constant dense<0.000000e+00> : vector<1xf32>
    %101 = vector.multi_reduction <add>, %100, %cst_35 [1, 2] : vector<1x8x1xf32> to vector<1xf32>
    %102 = vector.shape_cast %101 : vector<1xf32> to vector<1x1x1xf32>
    %103 = vector.extract %102[0, 0, 0] : f32 from vector<1x1x1xf32>
    %c0_36 = arith.constant 0 : index
    %c0_37 = arith.constant 0 : index
    %104 = memref.load %arg9[%c0_36, %c0_37] : memref<1x1xf32, #tpu.memory_space<smem>>
    %cst_38 = arith.constant 6.250000e-02 : f32
    %105 = arith.mulf %82, %cst_38 : f32
    %cst_39 = arith.constant 1.000000e-01 : f32
    %106 = arith.mulf %103, %cst_39 : f32
    %107 = arith.addf %105, %106 : f32
    %108 = arith.addf %104, %107 : f32
    %c0_40 = arith.constant 0 : index
    %c0_41 = arith.constant 0 : index
    %109 = memref.load %arg9[%c0_40, %c0_41] : memref<1x1xf32, #tpu.memory_space<smem>>
    memref.store %108, %arg9[%c0_40, %c0_41] : memref<1x1xf32, #tpu.memory_space<smem>>
    return
  }
  func.func @transform_0(%arg0: i32) -> (i32, i32, i32) {
    %c0_i32 = arith.constant 0 : i32
    %c0_i32_0 = arith.constant 0 : i32
    %c0_i32_1 = arith.constant 0 : i32
    return %arg0, %c0_i32, %c0_i32_0 : i32, i32, i32
  }
  func.func @transform_1(%arg0: i32) -> (i32, i32) {
    %c0_i32 = arith.constant 0 : i32
    %c0_i32_0 = arith.constant 0 : i32
    return %arg0, %c0_i32 : i32, i32
  }
  func.func @transform_2(%arg0: i32) -> (i32, i32) {
    %c0_i32 = arith.constant 0 : i32
    %c0_i32_0 = arith.constant 0 : i32
    return %arg0, %c0_i32 : i32, i32
  }
  func.func @transform_3(%arg0: i32) -> (i32, i32) {
    %c0_i32 = arith.constant 0 : i32
    %c0_i32_0 = arith.constant 0 : i32
    return %arg0, %c0_i32 : i32, i32
  }
  func.func @transform_4(%arg0: i32) -> (i32, i32) {
    %c0_i32 = arith.constant 0 : i32
    %c0_i32_0 = arith.constant 0 : i32
    return %arg0, %c0_i32 : i32, i32
  }
  func.func @transform_5(%arg0: i32) -> (i32, i32, i32) {
    %c0_i32 = arith.constant 0 : i32
    %c0_i32_0 = arith.constant 0 : i32
    %c0_i32_1 = arith.constant 0 : i32
    return %arg0, %c0_i32, %c0_i32_0 : i32, i32, i32
  }
  func.func @transform_6(%arg0: i32) -> (i32, i32) {
    %c0_i32 = arith.constant 0 : i32
    %c0_i32_0 = arith.constant 0 : i32
    return %arg0, %c0_i32 : i32, i32
  }
  func.func @transform_7(%arg0: i32) -> (i32, i32) {
    %c0_i32 = arith.constant 0 : i32
    %c0_i32_0 = arith.constant 0 : i32
    %c0_i32_1 = arith.constant 0 : i32
    return %c0_i32, %c0_i32_0 : i32, i32
  }
  func.func @transform_8(%arg0: i32) -> (i32, i32) {
    %c0_i32 = arith.constant 0 : i32
    %c0_i32_0 = arith.constant 0 : i32
    %c0_i32_1 = arith.constant 0 : i32
    return %c0_i32, %c0_i32_0 : i32, i32
  }
}

</mosaic_0001>

<bundles_post_ra>
// kernel: tpu_custom_call.1
= control target key start
LH: loop header
LB: loop body
LE: loop exit
PB: predicated region body
PF: predicated region fallthrough
CT: control target
= control target key end

     0   :  { %13 = vsyncpa [#allocation3], 0  ;;  %s1150_s0 = inlined_call_operand.hbm [shape: f32[8,8,128], index: 0, kind: input, shape index: {}]   ;;  %s1151_s1 = inlined_call_operand.vmem [shape: f32[8,1], index: 1, kind: input, shape index: {}]   ;;  %s1152_s2 = inlined_call_operand.vmem [shape: f32[8,8], index: 2, kind: input, shape index: {}]   ;;  %s1153_s3 = inlined_call_operand.vmem [shape: f32[8,8], index: 3, kind: input, shape index: {}]   ;;  %s1154_s4 = inlined_call_operand.vmem [shape: f32[8,1], index: 4, kind: input, shape index: {}]   ;;  %s1155_s5 = inlined_call_operand.hbm [shape: f32[8,8,128], index: 5, kind: input, shape index: {}]   ;;  %s1156_s6 = inlined_call_operand.hbm [shape: f32[8,8], index: 6, kind: input, shape index: {}]   ;;  %s1157_s7 = inlined_call_operand.vmem [shape: f32[1,128], index: 7, kind: input, shape index: {}]   ;;  %s1158_s8 = inlined_call_operand.hbm [shape: f32[1,1], index: 8, kind: output, shape index: {}]  }
   0x1   :  { %14 = vsyncpa [#allocation6], 0 }
   0x2   :  { %15 = vsyncpa [#allocation4], 0  ;;  %s41_s29 = sshll.u32 %s1155_s5, 4  ;;  %s991_s30 = smov [#allocation5]   ;;  %s42_s29 = int_to_ptr.hbm [resolvable:$true] %s41_s29 }
   0x3   :  { %s43_s9 = sshll.u32 %s991_s30, 4  ;;  %s20_s12 = sshll.u32 %s1150_s0, 4  ;;  %s44_s9 = int_to_ptr.vmem [resolvable:$true] %s43_s9  ;;  %s21_s12 = int_to_ptr.hbm [resolvable:$true] %s20_s12 }
   0x4   :  { %s992_s13 = smov 128   ;;  %s993_s14 = smov 8  }
   0x5   :  { %49 = dma.hbm_to_vmem [thread:$0]  %s42_s29, 1024, %s44_s9, [#allocation6], %s992_s13, %s992_s13, %s993_s14  }
   0x6   :  { %s994_s15 = smov [#allocation2]   ;;  %s55_s19 = sshll.u32 %s1156_s6, 4  ;;  %s56_s19 = int_to_ptr.hbm [resolvable:$true] %s55_s19 }
   0x7   :  { %s22_s16 = sshll.u32 %s994_s15, 4  ;;  %s995_s5 = smov [#allocation7]   ;;  %s23_s16 = int_to_ptr.vmem [resolvable:$true] %s22_s16 }
   0x8   :  { %28 = dma.hbm_to_vmem [thread:$0]  %s21_s12, 1024, %s23_s16, [#allocation3], %s992_s13, %s992_s13, %s993_s14  }
   0x9   :  { %s57_s20 = sshll.u32 %s995_s5, 4  ;;  %s58_s20 = int_to_ptr.vmem [resolvable:$true] %s57_s20 }
   0xa   :  { %60 = dma.hbm_to_vmem [thread:$0]  %s56_s19, 128, %s58_s20, [#allocation6]  }
   0xb   :  { %985 = dma.done.wait [#allocation3], 1024  }
   0xc   :  { %986 = vsyncadd [#allocation3], 4294966272 }
   0xd   :  { %987 = dma.done.wait [#allocation6], 1152  }
   0xe   :  { %988 = vsyncadd [#allocation6], 4294966144  ;;  %v996_v0 = vmov 0   ;;  %v1056_v1 = vld [vmem:[%s1151_s1] sm:$0xff]  ;;  %v112_v5 = vld [vmem:[#allocation2 + $0x8] sm:$0xff]  ;;  %v82_v12 = vlaneseq  ;;  %vm119_vm0 = vcmask 64512  }
   0xf   :  { %869 = vset.pattern.permute.xlu0 %v996_v0  ;;  %870 = vset.pattern.permute.xlu1 %v996_v0  ;;  %v101_v2 = vmax.f32 %v1056_v1, 1.0  ;;  %v111_v4 = vld [vmem:[#allocation2] sm:$0xff]  ;;  %v113_v6 = vld [vmem:[#allocation2 + $0x10] sm:$0xff]  ;;  %v114_v7 = vld [vmem:[#allocation2 + $0x18] sm:$0xff]  ;;  %v997_v17 = vmov 0.0   ;;  %vm546_vm2 = vcmask 1041409  }
  0x10   :  { %871 = vset.pattern.permute.xlu2 %v996_v0  ;;  %87 = vperm.xlu0 %869, %v1056_v1   ;;  %v115_v8 = vld [vmem:[#allocation2 + $0x20] sm:$0xff]  ;;  %v116_v9 = vld [vmem:[#allocation2 + $0x28] sm:$0xff]  ;;  %v117_v10 = vld [vmem:[#allocation2 + $0x30] sm:$0xff]  ;;  %v1061_v13 = vand.u32 127, %v82_v12  ;;  %vm549_vm3 = vcmask 1042434   ;;  %vm552_vm4 = vcmask 1043459  }
  0x11   :  { %873 = vrcp.f32 %v101_v2  ;;  %137 = vmatpush.msra.mxu0 %v111_v4  ;;  %159 = vmatpush.msra.mxu1 %v112_v5  ;;  %v118_v11 = vld [vmem:[#allocation2 + $0x38] sm:$0xff]  ;;  %v296_v16 = vld [vmem:[%s1152_s2] sm:$0xff]  ;;  %v359_v28 = vld [vmem:[#allocation5 + $0x10] sm:$0xff]  ;;  %vm555_vm5 = vcmask 1044484   ;;  %vm558_vm6 = vcmask 1045509   ;;  %vm561_vm7 = vcmask 1046534  }
  0x12   :  { %181 = vmatpush.msra.mxu2 %v113_v6  ;;  %203 = vmatpush.msra.mxu3 %v114_v7  ;;  %v84_v14 = vcvt.s32.f32 %v1061_v13  ;;  %v360_v29 = vld [vmem:[#allocation5 + $0x18] sm:$0xff]  ;;  %v357_v30 = vld [vmem:[#allocation5] sm:$0xff]  ;;  %v358_v34 = vld [vmem:[#allocation5 + $0x8] sm:$0xff]  ;;  %vm564_vm8 = vcmask 1047559   ;;  %vm809_vm11 = vcmask 7168   ;;  %vm750_vm12 = vcmp.eq.s32.totalorder %v1061_v13, 0 }
  0x13   :  { %225 = vmatpush.msrb.mxu0 %v115_v8  ;;  %247 = vmatpush.msrb.mxu1 %v116_v9  ;;  %v363_v35 = vld [vmem:[#allocation5 + $0x30] sm:$0xff]  ;;  %v364_v36 = vld [vmem:[#allocation5 + $0x38] sm:$0xff]  ;;  %v361_v37 = vld [vmem:[#allocation5 + $0x20] sm:$0xff]  ;;  %s832_s9 = sshll.u32 %s1158_s8, 4  ;;  %s998_s11 = smov [#allocation8]   ;;  %s833_s9 = int_to_ptr.hbm [resolvable:$true] %s832_s9 }
  0x14   :  { %269 = vmatpush.msrb.mxu2 %v117_v10  ;;  %291 = vmatpush.msrb.mxu3 %v118_v11  ;;  %v362_v38 = vld [vmem:[#allocation5 + $0x28] sm:$0xff]  ;;  %v872_v9 = vld [vmem:[%s1157_s7] ss:$0 sm:$0xff] }
  0x17   :  { %v874_v3 = vpop.eup %873 }
  0x18   :  { %304 = vperm.xlu1 %870, %v874_v3  }
  0x82   :  { %v88_v15 = vpop.permute.xlu0 %87 }
  0x83   :  { %vm90_vm1 = vcmp.lt.f32.partialorder %v84_v14, %v88_v15 }
  0x84   :  { %v844_v18 = vsel %vm90_vm1, 1.0, %v997_v17 }
  0x85   :  { %846 = vmatmul.msk.f32.vlgmr.msra.gmra.mxu0 %vm119_vm0, %v844_v18  ;;  %v104_v19 = vrot.slane %v844_v18, 1  ;;  %v105_v20 = vrot.slane %v844_v18, 2  ;;  %v106_v21 = vrot.slane %v844_v18, 3  ;;  %v297_v22 = vmul.f32 %v844_v18, %v296_v16 }
  0x86   :  { %v107_v24 = vrot.slane %v844_v18, 4  ;;  %v108_v25 = vrot.slane %v844_v18, 5  ;;  %v109_v26 = vrot.slane %v844_v18, 6  ;;  %v110_v27 = vrot.slane %v844_v18, 7  ;;  %380 = vmatpush.xpose.msra.mxu0 %v357_v30 }
  0x87   :  { %847 = vmatmul.msk.f32.vlgmr.msra.gmra.mxu1 %vm119_vm0, %v104_v19  ;;  %848 = vmatmul.msk.f32.vlgmr.msra.gmra.mxu2 %vm119_vm0, %v105_v20  ;;  %v298_v23 = vsel %vm119_vm0, %v297_v22, 0.0 }
  0x88   :  { %849 = vmatmul.msk.f32.vlgmr.msra.gmra.mxu3 %vm119_vm0, %v106_v21  ;;  %299 = vadd.xlane.f32.xlu0 %v298_v23 }
  0x89   :  { %420 = vmatpush.xpose.msra.mxu2 %v359_v28  ;;  %440 = vmatpush.xpose.msra.mxu3 %v360_v29 }
  0x8a   :  { %400 = vmatpush.xpose.msra.mxu1 %v358_v34  ;;  %v305_v43 = vpop.permute.xlu1 %304 }
  0x8b   :  { %v306_v44 = vrot.slane %v305_v43, 1  ;;  %v307_v45 = vrot.slane %v305_v43, 2  ;;  %v309_v46 = vrot.slane %v305_v43, 4  ;;  %v308_v47 = vrot.slane %v305_v43, 3 }
  0x8c   :  { %v310_v50 = vrot.slane %v305_v43, 5  ;;  %v311_v51 = vrot.slane %v305_v43, 6  ;;  %v312_v52 = vrot.slane %v305_v43, 7 }
  0x8d   :  { %850 = vmatmul.msk.f32.vlgmr.msrb.gmra.mxu0 %vm119_vm0, %v107_v24 }
  0x8e   :  { %460 = vmatpush.xpose.msrb.mxu0 %v361_v37 }
  0x8f   :  { %851 = vmatmul.msk.f32.vlgmr.msrb.gmra.mxu1 %vm119_vm0, %v108_v25  ;;  %852 = vmatmul.msk.f32.vlgmr.msrb.gmra.mxu2 %vm119_vm0, %v109_v26 }
  0x90   :  { %853 = vmatmul.msk.f32.vlgmr.msrb.gmra.mxu3 %vm119_vm0, %v110_v27  ;;  %500 = vmatpush.xpose.msrb.mxu2 %v363_v35 }
  0x91   :  { %520 = vmatpush.xpose.msrb.mxu3 %v364_v36  ;;  %480 = vmatpush.xpose.msrb.mxu1 %v362_v38 }
  0xfb   :  { %v300_v31 = vpop.xlane.xlu0 %299 }
  0xfc   :  { %v301_v32 = vmul.f32 %v874_v3, %v300_v31 }
  0xfe   :  { %v329_v33 = vmul.f32 0.001, %v301_v32 }
 0x100   :  { %332 = vperm.xlu1 %870, %v329_v33  }
 0x102   :  { %v139_v39 = vpop.f32.mrf.mxu0 }
 0x103   :  { %v321_v58 = vmul.f32 %v305_v43, %v139_v39 }
 0x104   :  { %v161_v40 = vpop.f32.mrf.mxu1 }
 0x105   :  { %v322_v55 = vmul.f32 %v306_v44, %v161_v40 }
 0x10a   :  { %v183_v41 = vpop.f32.mrf.mxu2  ;;  %v227_v48 = vpop.f32.mrf.mxu0 }
 0x10b   :  { %v205_v42 = vpop.f32.mrf.mxu3  ;;  %v323_v56 = vmul.f32 %v307_v45, %v183_v41  ;;  %v325_v57 = vmul.f32 %v309_v46, %v227_v48 }
 0x10c   :  { %v249_v49 = vpop.f32.mrf.mxu1  ;;  %v324_v59 = vmul.f32 %v308_v47, %v205_v42 }
 0x10d   :  { %v326_v60 = vmul.f32 %v310_v50, %v249_v49 }
 0x112   :  { %v271_v53 = vpop.f32.mrf.mxu2 }
 0x113   :  { %v293_v54 = vpop.f32.mrf.mxu3  ;;  %v327_v61 = vmul.f32 %v311_v51, %v271_v53 }
 0x114   :  { %v328_v62 = vmul.f32 %v312_v52, %v293_v54 }
 0x172   :  { %v333_v63 = vpop.permute.xlu1 %332 }
 0x173   :  { %v349_v0 = vadd.f32 %v333_v63, %v321_v58  ;;  %v334_v2 = vrot.slane %v333_v63, 1  ;;  %v335_v3 = vrot.slane %v333_v63, 2  ;;  %v336_v4 = vrot.slane %v333_v63, 3 }
 0x174   :  { %v337_v5 = vrot.slane %v333_v63, 4  ;;  %v338_v6 = vrot.slane %v333_v63, 5  ;;  %v339_v7 = vrot.slane %v333_v63, 6  ;;  %v340_v8 = vrot.slane %v333_v63, 7 }
 0x175   :  { %381 = vmatmul.f32.vlgmr.msra.gmra.mxu0 %v349_v0  ;;  %v350_v10 = vadd.f32 %v334_v2, %v322_v55  ;;  %v351_v11 = vadd.f32 %v335_v3, %v323_v56  ;;  %v352_v15 = vadd.f32 %v336_v4, %v324_v59  ;;  %v529_v25 = vmul.f32 %v872_v9, %v349_v0  ;;  %v569_v3 = vld [vmem:[#allocation7] sm:$0xff] }
 0x176   :  { %v353_v16 = vadd.f32 %v337_v5, %v325_v57  ;;  %v354_v18 = vadd.f32 %v338_v6, %v326_v60  ;;  %v355_v19 = vadd.f32 %v339_v7, %v327_v61  ;;  %v356_v20 = vadd.f32 %v340_v8, %v328_v62 }
 0x177   :  { %401 = vmatmul.f32.vlgmr.msra.gmra.mxu1 %v350_v10  ;;  %v530_v21 = vmul.f32 %v872_v9, %v350_v10  ;;  %421 = vmatmul.f32.vlgmr.msra.gmra.mxu2 %v351_v11  ;;  %v531_v22 = vmul.f32 %v872_v9, %v351_v11  ;;  %v532_v23 = vmul.f32 %v872_v9, %v352_v15  ;;  %v570_v4 = vsel %vm119_vm0, %v569_v3, -inf }
 0x178   :  { %441 = vmatmul.f32.vlgmr.msra.gmra.mxu3 %v352_v15  ;;  %v533_v24 = vmul.f32 %v872_v9, %v353_v16  ;;  %v534_v28 = vmul.f32 %v872_v9, %v354_v18  ;;  %v535_v29 = vmul.f32 %v872_v9, %v355_v19  ;;  %v536_v31 = vmul.f32 %v872_v9, %v356_v20 }
 0x179   :  { %v545_v26 = vrot.slane %v530_v21, 7  ;;  %v548_v27 = vrot.slane %v531_v22, 6  ;;  %v551_v30 = vrot.slane %v532_v23, 5  ;;  %v854_v5 = vadd.f32 -1.0, %v1056_v1 }
 0x17a   :  { %v554_v33 = vrot.slane %v533_v24, 4  ;;  %v557_v36 = vrot.slane %v534_v28, 3  ;;  %v560_v38 = vrot.slane %v535_v29, 2  ;;  %v563_v40 = vrot.slane %v536_v31, 1 }
 0x17b   :  { %v547_v32 = vsel %vm546_vm2, %v545_v26, %v529_v25 }
 0x17c   :  { %v550_v34 = vsel %vm549_vm3, %v548_v27, %v547_v32 }
 0x17d   :  { %461 = vmatmul.f32.vlgmr.msrb.gmra.mxu0 %v353_v16  ;;  %v553_v35 = vsel %vm552_vm4, %v551_v30, %v550_v34 }
 0x17e   :  { %v556_v37 = vsel %vm555_vm5, %v554_v33, %v553_v35 }
 0x17f   :  { %481 = vmatmul.f32.vlgmr.msrb.gmra.mxu1 %v354_v18  ;;  %501 = vmatmul.f32.vlgmr.msrb.gmra.mxu2 %v355_v19  ;;  %v559_v39 = vsel %vm558_vm6, %v557_v36, %v556_v37 }
 0x180   :  { %521 = vmatmul.f32.vlgmr.msrb.gmra.mxu3 %v356_v20  ;;  %v562_v41 = vsel %vm561_vm7, %v560_v38, %v559_v39 }
 0x181   :  { %v1089_v42 = vsel %vm564_vm8, %v563_v40, %v562_v41 }
 0x1f2   :  { %v382_v43 = vpop.f32.mrf.mxu0 }
 0x1f4   :  { %v402_v44 = vpop.f32.mrf.mxu1 }
 0x1f5   :  { %v589_v45 = vrot.slane %v402_v44, 7 }
 0x1f7   :  { %v590_v49 = vsel %vm546_vm2, %v589_v45, %v382_v43  ;;  %v798_v45 = vld [vmem:[%s1153_s3] sm:$0xff] }
 0x1fa   :  { %v422_v46 = vpop.f32.mrf.mxu2  ;;  %v462_v51 = vpop.f32.mrf.mxu0 }
 0x1fb   :  { %v591_v47 = vrot.slane %v422_v46, 6  ;;  %v442_v48 = vpop.f32.mrf.mxu3  ;;  %v595_v55 = vrot.slane %v462_v51, 4 }
 0x1fc   :  { %v593_v50 = vrot.slane %v442_v48, 5  ;;  %v482_v53 = vpop.f32.mrf.mxu1 }
 0x1fd   :  { %v592_v52 = vsel %vm549_vm3, %v591_v47, %v590_v49  ;;  %v597_v56 = vrot.slane %v482_v53, 3 }
 0x1fe   :  { %v594_v54 = vsel %vm552_vm4, %v593_v50, %v592_v52 }
 0x1ff   :  { %v596_v57 = vsel %vm555_vm5, %v595_v55, %v594_v54 }
 0x200   :  { %v598_v61 = vsel %vm558_vm6, %v597_v56, %v596_v57 }
 0x202   :  { %v502_v58 = vpop.f32.mrf.mxu2 }
 0x203   :  { %v599_v59 = vrot.slane %v502_v58, 2  ;;  %v522_v60 = vpop.f32.mrf.mxu3 }
 0x204   :  { %v601_v62 = vrot.slane %v522_v60, 1 }
 0x205   :  { %v600_v63 = vsel %vm561_vm7, %v599_v59, %v598_v61 }
 0x206   :  { %v602_v0 = vsel %vm564_vm8, %v601_v62, %v600_v63 }
 0x207   :  { %v604_v2 = vsel %vm119_vm0, %v602_v0, -inf }
 0x208   :  { %605 = vmax.xlane.f32.xlu2 %v604_v2 }
 0x210   :  { %571 = vmax.xlane.f32.xlu2 %v570_v4  ;;  %v803_v4 = vld [vmem:[%s1154_s4] sm:$0xff] }
 0x228   :  { %792 = vperm.xlu2 %871, %v854_v5  }
 0x27b   :  { %v606_v6 = vpop.xlane.xlu2 %605 }
 0x27c   :  { %v608_v7 = vrot.slane %v606_v6, 1  ;;  %v609_v8 = vrot.slane %v606_v6, 2  ;;  %v610_v9 = vrot.slane %v606_v6, 3  ;;  %v611_v10 = vrot.slane %v606_v6, 4 }
 0x27d   :  { %v612_v11 = vrot.slane %v606_v6, 5  ;;  %v623_v15 = vsub.f32 %v382_v43, %v606_v6  ;;  %v613_v16 = vrot.slane %v606_v6, 6  ;;  %v614_v18 = vrot.slane %v606_v6, 7 }
 0x27e   :  { %v624_v19 = vsub.f32 %v402_v44, %v608_v7  ;;  %v625_v20 = vsub.f32 %v422_v46, %v609_v8  ;;  %v626_v21 = vsub.f32 %v442_v48, %v610_v9  ;;  %v627_v22 = vsub.f32 %v462_v51, %v611_v10 }
 0x27f   :  { %v631_v23 = vmul.f32 1.442695, %v623_v15  ;;  %v628_v24 = vsub.f32 %v482_v53, %v612_v11  ;;  %v629_v25 = vsub.f32 %v502_v58, %v613_v16  ;;  %v630_v28 = vsub.f32 %v522_v60, %v614_v18 }
 0x280   :  { %v633_v26 = vmul.f32 1.442695, %v624_v19  ;;  %v635_v27 = vmul.f32 1.442695, %v625_v20  ;;  %v637_v1 = vmul.f32 1.442695, %v626_v21 }
 0x281   :  { %875 = vpow2.f32 %v631_v23  ;;  %v639_v29 = vmul.f32 1.442695, %v627_v22  ;;  %v641_v30 = vmul.f32 1.442695, %v628_v24  ;;  %v643_v32 = vmul.f32 1.442695, %v629_v25 }
 0x282   :  { %877 = vpow2.f32 %v633_v26  ;;  %v645_v34 = vmul.f32 1.442695, %v630_v28  ;;  %v95_v7 = vshrl.u32 %v82_v12, 7 }
 0x283   :  { %879 = vpow2.f32 %v635_v27  ;;  %v572_v31 = vpop.xlane.xlu2 %571 }
 0x284   :  { %v573_v33 = vsub.f32 %v569_v3, %v572_v31  ;;  %881 = vpow2.f32 %v637_v1  ;;  %vm98_vm10 = vcmp.lt.s32.totalorder %v95_v7, 2 }
 0x285   :  { %883 = vpow2.f32 %v639_v29  ;;  %v1126_v19 = vsel %vm98_vm10, 1.0, %v997_v17 }
 0x286   :  { %v574_v35 = vmul.f32 1.442695, %v573_v33  ;;  %885 = vpow2.f32 %v641_v30 }
 0x287   :  { %v1101_v36 = vpop.eup %875  ;;  %887 = vpow2.f32 %v643_v32 }
 0x288   :  { %v878_v37 = vpop.eup %877  ;;  %889 = vpow2.f32 %v574_v35 }
 0x289   :  { %v880_v38 = vpop.eup %879  ;;  %891 = vpow2.f32 %v645_v34  ;;  %v655_v39 = vrot.slane %v878_v37, 7 }
 0x28a   :  { %v882_v40 = vpop.eup %881  ;;  %v657_v41 = vrot.slane %v880_v38, 6 }
 0x28b   :  { %v884_v43 = vpop.eup %883  ;;  %v793_v44 = vpop.permute.xlu2 %792  ;;  %v656_v46 = vsel %vm546_vm2, %v655_v39, %v1101_v36  ;;  %v659_v47 = vrot.slane %v882_v40, 5 }
 0x28c   :  { %v886_v48 = vpop.eup %885  ;;  %vm795_vm9 = vcmp.eq.f32.partialorder %v84_v14, %v793_v44  ;;  %v658_v49 = vsel %vm549_vm3, %v657_v41, %v656_v46  ;;  %v661_v50 = vrot.slane %v884_v43, 4 }
 0x28d   :  { %v888_v51 = vpop.eup %887  ;;  %v855_v52 = vsel %vm795_vm9, 1.0, %v997_v17  ;;  %v660_v53 = vsel %vm552_vm4, %v659_v47, %v658_v49  ;;  %v663_v54 = vrot.slane %v886_v48, 3 }
 0x28e   :  { %v890_v55 = vpop.eup %889  ;;  %v799_v56 = vmul.f32 %v855_v52, %v798_v45  ;;  %v662_v57 = vsel %vm555_vm5, %v661_v50, %v660_v53  ;;  %v665_v58 = vrot.slane %v888_v51, 2 }
 0x28f   :  { %v892_v59 = vpop.eup %891  ;;  %v576_v60 = vsel %vm119_vm0, %v890_v55, 0.0  ;;  %v664_v61 = vsel %vm558_vm6, %v663_v54, %v662_v57 }
 0x290   :  { %577 = vadd.xlane.f32.xlu2 %v576_v60  ;;  %v800_v14 = vsel %vm119_vm0, %v799_v56, 0.0  ;;  %v666_v62 = vsel %vm561_vm7, %v665_v58, %v664_v61  ;;  %v667_v63 = vrot.slane %v892_v59, 1 }
 0x291   :  { %801 = vadd.xlane.f32.xlu0 %v800_v14 }
 0x292   :  { %v668_v0 = vsel %vm564_vm8, %v667_v63, %v666_v62 }
 0x293   :  { %v670_v2 = vsel %vm119_vm0, %v668_v0, 0.0 }
 0x294   :  { %671 = vadd.xlane.f32.xlu1 %v670_v2 }
 0x299   :  { %567 = vadd.xlane.f32.xlu0 %v1089_v42 }
 0x303   :  { %v578_v8 = vpop.xlane.xlu2 %577 }
 0x304   :  { %v802_v3 = vpop.xlane.xlu0 %801 }
 0x305   :  { %v804_v6 = vsub.f32 %v803_v4, %v802_v3 }
 0x307   :  { %v672_v5 = vpop.xlane.xlu1 %671 }
 0x308   :  { %893 = vrcp.f32 %v672_v5 }
 0x309   :  { %895 = vrcp.f32 %v578_v8 }
 0x30c   :  { %v568_v9 = vpop.xlane.xlu0 %567 }
 0x30d   :  { %v805_v10 = vsub.f32 %v568_v9, %v804_v6 }
 0x30e   :  { %v894_v11 = vpop.eup %893 }
 0x30f   :  { %v806_v15 = vmul.f32 0.00023148148, %v805_v10  ;;  %v675_v16 = vrot.slane %v894_v11, 1  ;;  %v676_v18 = vrot.slane %v894_v11, 2  ;;  %v677_v42 = vrot.slane %v894_v11, 3  ;;  %v896_v28 = vpop.eup %895 }
 0x310   :  { %v678_v20 = vrot.slane %v894_v11, 4  ;;  %v679_v21 = vrot.slane %v894_v11, 5  ;;  %v680_v22 = vrot.slane %v894_v11, 6  ;;  %v681_v24 = vrot.slane %v894_v11, 7 }
 0x311   :  { %v807_v23 = vmul.f32 %v806_v15, %v806_v15  ;;  %v691_v25 = vmul.f32 %v878_v37, %v675_v16  ;;  %v692_v12 = vmul.f32 %v880_v38, %v676_v18  ;;  %v690_v26 = vmul.f32 %v894_v11, %v1101_v36 }
 0x312   :  { %v693_v27 = vmul.f32 %v882_v40, %v677_v42  ;;  %v694_v1 = vmul.f32 %v884_v43, %v678_v20  ;;  %v695_v30 = vmul.f32 %v886_v48, %v679_v21  ;;  %v696_v17 = vmul.f32 %v888_v51, %v680_v22 }
 0x313   :  { %v808_v29 = vmul.f32 %v1126_v19, %v807_v23  ;;  %v707_v31 = vrot.slane %v691_v25, 7  ;;  %v709_v32 = vrot.slane %v692_v12, 6  ;;  %v697_v34 = vmul.f32 %v892_v59, %v681_v24 }
 0x314   :  { %v711_v39 = vrot.slane %v693_v27, 5  ;;  %v580_v41 = vmul.f32 %v896_v28, %v890_v55  ;;  %v713_v38 = vrot.slane %v694_v1, 4  ;;  %v715_v40 = vrot.slane %v695_v30, 3 }
 0x315   :  { %v810_v33 = vsel %vm809_vm11, %v808_v29, 0.0  ;;  %v708_v35 = vsel %vm546_vm2, %v707_v31, %v690_v26  ;;  %v717_v44 = vrot.slane %v696_v17, 2  ;;  %v719_v46 = vrot.slane %v697_v34, 1 }
 0x316   :  { %811 = vadd.xlane.f32.xlu0 %v810_v33  ;;  %v710_v37 = vsel %vm549_vm3, %v709_v32, %v708_v35  ;;  %v698_v47 = vmul.f32 7.0, %v580_v41 }
 0x317   :  { %v712_v36 = vsel %vm552_vm4, %v711_v39, %v710_v37 }
 0x318   :  { %v714_v43 = vsel %vm555_vm5, %v713_v38, %v712_v36 }
 0x319   :  { %v716_v45 = vsel %vm558_vm6, %v715_v40, %v714_v43 }
 0x31a   :  { %v718_v48 = vsel %vm561_vm7, %v717_v44, %v716_v45 }
 0x31b   :  { %v720_v49 = vsel %vm564_vm8, %v719_v46, %v718_v48 }
 0x31c   :  { %v722_v50 = vadd.f32 %v720_v49, %v698_v47 }
 0x31e   :  { %v723_v51 = vadd.f32 1e-06, %v722_v50 }
 0x320   :  { %897 = vrcp.f32 %v723_v51 }
 0x326   :  { %v898_v52 = vpop.eup %897 }
 0x327   :  { %v726_v53 = vrot.slane %v898_v52, 1  ;;  %v727_v54 = vrot.slane %v898_v52, 2  ;;  %v728_v55 = vrot.slane %v898_v52, 3  ;;  %v729_v56 = vrot.slane %v898_v52, 4 }
 0x328   :  { %v730_v57 = vrot.slane %v898_v52, 5  ;;  %v731_v58 = vrot.slane %v898_v52, 6  ;;  %v732_v59 = vrot.slane %v898_v52, 7  ;;  %v741_v63 = vmul.f32 %v898_v52, %v690_v26 }
 0x329   :  { %v742_v60 = vmul.f32 %v726_v53, %v691_v25  ;;  %v743_v61 = vmul.f32 %v727_v54, %v692_v12  ;;  %v744_v14 = vmul.f32 %v728_v55, %v693_v27  ;;  %v745_v62 = vmul.f32 %v729_v56, %v694_v1 }
 0x32a   :  { %v746_v0 = vmul.f32 %v730_v57, %v695_v30  ;;  %v747_v4 = vmul.f32 %v731_v58, %v696_v17  ;;  %v748_v5 = vmul.f32 %v732_v59, %v697_v34  ;;  %v749_v20 = vmul.f32 %v898_v52, %v580_v41 }
 0x32b   :  { %v759_v2 = vrot.slane %v742_v60, 7  ;;  %v761_v3 = vrot.slane %v743_v61, 6  ;;  %v763_v7 = vrot.slane %v744_v14, 5  ;;  %v765_v9 = vrot.slane %v745_v62, 4 }
 0x32c   :  { %v767_v11 = vrot.slane %v746_v0, 3  ;;  %v769_v16 = vrot.slane %v747_v4, 2  ;;  %v771_v42 = vrot.slane %v748_v5, 1 }
 0x32d   :  { %v760_v6 = vsel %vm546_vm2, %v759_v2, %v741_v63 }
 0x32e   :  { %v762_v8 = vsel %vm549_vm3, %v761_v3, %v760_v6 }
 0x32f   :  { %v764_v10 = vsel %vm552_vm4, %v763_v7, %v762_v8 }
 0x330   :  { %v766_v15 = vsel %vm555_vm5, %v765_v9, %v764_v10 }
 0x331   :  { %v768_v18 = vsel %vm558_vm6, %v767_v11, %v766_v15 }
 0x332   :  { %v770_v21 = vsel %vm561_vm7, %v769_v16, %v768_v18 }
 0x333   :  { %v772_v22 = vsel %vm564_vm8, %v771_v42, %v770_v21 }
 0x334   :  { %v774_v23 = vsel %vm750_vm12, %v772_v22, %v749_v20 }
 0x335   :  { %899 = vlog2.f32 %v774_v23 }
 0x33b   :  { %v900_v24 = vpop.eup %899 }
 0x33c   :  { %v776_v25 = vmul.f32 0.6931472, %v900_v24 }
 0x33e   :  { %v777_v12 = vmul.f32 %v1126_v19, %v776_v25 }
 0x340   :  { %v778_v26 = vsel %vm119_vm0, %v777_v12, 0.0 }
 0x341   :  { %779 = vadd.xlane.f32.xlu1 %v778_v26 }
 0x389   :  { %v812_v27 = vpop.xlane.xlu0 %811 }
 0x38a   :  { %v813_v1 = vrot.slane %v812_v27, 4 }
 0x38c   :  { %v814_v13 = vadd.f32 %v813_v1, %v812_v27 }
 0x38e   :  { %v815_v28 = vrot.slane %v814_v13, 2 }
 0x390   :  { %v816_v32 = vadd.f32 %v815_v28, %v814_v13 }
 0x392   :  { %v817_v34 = vrot.slane %v816_v32, 1 }
 0x394   :  { %v818_v41 = vadd.f32 %v817_v34, %v816_v32 }
 0x3b4   :  { %v780_v29 = vpop.xlane.xlu1 %779 }
 0x3b5   :  { %v781_v30 = vrot.slane %v780_v29, 4 }
 0x3b7   :  { %v782_v31 = vadd.f32 %v781_v30, %v780_v29 }
 0x3b9   :  { %v783_v17 = vrot.slane %v782_v31, 2 }
 0x3bb   :  { %v784_v33 = vadd.f32 %v783_v17, %v782_v31 }
 0x3bd   :  { %v785_v35 = vrot.slane %v784_v33, 1 }
 0x3bf   :  { %v786_v39 = vadd.f32 %v785_v35, %v784_v33 }
 0x3c1   :  { %856 = vpush %v786_v39 }
 0x3c2   :  { %858 = vpush %v818_v41 }
 0x3f2   :  { %s857_s4 = spop %856 }
 0x3f3   :  { %s788_s25 = ssub.f32 0.0, %s857_s4  ;;  %s859_s26 = spop %858 }
 0x3f4   :  { %s822_s27 = smul.f32 0.1, %s859_s26 }
 0x3f5   :  { %s821_s28 = smul.f32 0.0625, %s788_s25 }
 0x3f7   :  { %s823_s10 = sadd.f32 %s822_s27, %s821_s28 }
 0x3f9   :  { %826 = sst [smem:[#allocation8]] %s823_s10 }
 0x3fa   :  { %835 = dma.smem_to_hbm %s998_s11, 16, %s833_s9, [#allocation4]  }
 0x3fb   :  { %989 = dma.done.wait [#allocation4], 16  }
 0x3fc   :  { %990 = vsyncadd [#allocation4], 4294967280 }
 0x3fd   :  { %840 = sfence }
 0x3fe   :  { %841 = vsyncpa [#allocation3], 1 }
 0x3ff   :  { %842 = vsyncpa [#allocation6], 1 }
 0x400   :  { %843 = vsyncpa [#allocation4], 1 }

</bundles_post_ra>
